<compile_context>
chip_gen: v5e
topology: v5e:2x2
jax: 0.10.0
libtpu: 0.0.40
codegen_flags: <defaults>
</compile_context>

<pallas_src>
import functools
import math

import jax
import jax.numpy as jnp
from jax.experimental import pallas as pl
from jax.experimental.pallas import tpu as pltpu

# ---------------- small-BERT config (deterministic stand-in for bert-base-chinese) ---
VOCAB = 128
MAX_POS = 32
TYPE_VOCAB = 2
HIDDEN = 64
N_HEADS = 2
HEAD_DIM = HIDDEN // N_HEADS
INTERMEDIATE = 128
N_LAYERS = 2
NUM_LABELS = 3
LN_EPS = 1e-12


# ---------------- in-kernel helpers ----------------
def _gelu_tanh(x):
    # TODO(synk): HF BERT uses exact erf-GELU; tanh approximation used here (EUP-friendly).
    c = math.sqrt(2.0 / math.pi)
    return 0.5 * x * (1.0 + jnp.tanh(c * (x + 0.044715 * x * x * x)))


def _layernorm(x, g, b):
    mu = jnp.mean(x, axis=-1, keepdims=True)
    var = jnp.mean(jnp.square(x - mu), axis=-1, keepdims=True)
    return (x - mu) * jax.lax.rsqrt(var + LN_EPS) * g + b


# ---------------- fused encoder kernel ----------------
def _encoder_kernel(x_ref, mask_ref, emb_g_ref, emb_b_ref,
                    wqkv_ref, bqkv_ref, wo_ref, bo_ref, ln1_g_ref, ln1_b_ref,
                    w1_ref, b1_ref, w2_ref, b2_ref, ln2_g_ref, ln2_b_ref,
                    o_ref, h_ref, *, n_heads, head_dim):
    l = pl.program_id(1)

    # layer 0: embedding LayerNorm (no residual, no zero tensor DMA'd from HBM)
    @pl.when(l == 0)
    def _():
        h_ref[...] = _layernorm(x_ref[0], emb_g_ref[...], emb_b_ref[...])

    h = h_ref[...]                                   # (S, H) f32, resident in VMEM
    hid = h.shape[-1]
    scale = 1.0 / math.sqrt(head_dim)

    # ---- fused QKV projection (bf16 MXU, f32 accumulate) ----
    qkv = jnp.dot(h.astype(jnp.bfloat16), wqkv_ref[0],
                  preferred_element_type=jnp.float32) + bqkv_ref[0]   # (S, 3H)

    # additive key mask computed in-kernel from the raw attention mask
    bias = (1.0 - mask_ref[0]) * -1e9                # (1, S)

    # ---- multi-head self-attention (all heads in one grid step, unrolled) ----
    ctx_heads = []
    for hh in range(n_heads):
        q_h = qkv[:, hh * head_dim:(hh + 1) * head_dim].astype(jnp.bfloat16)
        k_h = qkv[:, hid + hh * head_dim: hid + (hh + 1) * head_dim].astype(jnp.bfloat16)
        v_h = qkv[:, 2 * hid + hh * head_dim: 2 * hid + (hh + 1) * head_dim].astype(jnp.bfloat16)
        s = jax.lax.dot_general(q_h, k_h, (((1,), (1,)), ((), ())),
                                preferred_element_type=jnp.float32) * scale + bias  # (S, S)
        m = jnp.max(s, axis=-1, keepdims=True)
        p = jnp.exp(s - m)
        p = p / jnp.sum(p, axis=-1, keepdims=True)
        ctx_heads.append(jnp.dot(p.astype(jnp.bfloat16), v_h,
                                 preferred_element_type=jnp.float32))
    ctx = jnp.concatenate(ctx_heads, axis=-1)        # (S, H) == merge_heads

    # ---- attention output projection + residual + LayerNorm ----
    attn_out = jnp.dot(ctx.astype(jnp.bfloat16), wo_ref[0],
                       preferred_element_type=jnp.float32) + bo_ref[0]
    h1 = _layernorm(attn_out + h, ln1_g_ref[0], ln1_b_ref[0])

    # ---- FFN (GELU in f32) + residual + LayerNorm ----
    ff = jnp.dot(h1.astype(jnp.bfloat16), w1_ref[0],
                 preferred_element_type=jnp.float32) + b1_ref[0]
    ff = _gelu_tanh(ff)
    ff = jnp.dot(ff.astype(jnp.bfloat16), w2_ref[0],
                 preferred_element_type=jnp.float32) + b2_ref[0]
    h2 = _layernorm(ff + h1, ln2_g_ref[0], ln2_b_ref[0])

    h_ref[...] = h2                                  # carry to next layer (VMEM-resident)
    o_ref[0] = h2.astype(o_ref.dtype)


def encoder_stack(params, x, mask):
    """x: (B, S, HIDDEN) f32 embeddings; mask: (B, 1, S) f32 attention mask."""
    B, S, _ = x.shape
    wmap = lambda b, l: (l, 0, 0)     # per-layer stacked weights
    bmap = lambda b, l: (b, 0, 0)     # per-batch activations / mask
    cmap = lambda b, l: (0, 0)        # constants (embedding LN params)

    return pl.pallas_call(
        functools.partial(_encoder_kernel, n_heads=N_HEADS, head_dim=HEAD_DIM),
        out_shape=jax.ShapeDtypeStruct((B, S, HIDDEN), jnp.float32),
        grid=(B, N_LAYERS),
        in_specs=[
            pl.BlockSpec((1, S, HIDDEN), bmap),                    # x (embeddings)
            pl.BlockSpec((1, 1, S), bmap),                         # attention mask
            pl.BlockSpec((1, HIDDEN), cmap),                       # emb LN gamma
            pl.BlockSpec((1, HIDDEN), cmap),                       # emb LN beta
            pl.BlockSpec((1, HIDDEN, 3 * HIDDEN), wmap),           # wqkv (bf16)
            pl.BlockSpec((1, 1, 3 * HIDDEN), wmap),                # bqkv
            pl.BlockSpec((1, HIDDEN, HIDDEN), wmap),               # wo (bf16)
            pl.BlockSpec((1, 1, HIDDEN), wmap),                    # bo
            pl.BlockSpec((1, 1, HIDDEN), wmap),                    # attn LN gamma
            pl.BlockSpec((1, 1, HIDDEN), wmap),                    # attn LN beta
            pl.BlockSpec((1, HIDDEN, INTERMEDIATE), wmap),         # w1 (bf16)
            pl.BlockSpec((1, 1, INTERMEDIATE), wmap),              # b1
            pl.BlockSpec((1, INTERMEDIATE, HIDDEN), wmap),         # w2 (bf16)
            pl.BlockSpec((1, 1, HIDDEN), wmap),                    # b2
            pl.BlockSpec((1, 1, HIDDEN), wmap),                    # ffn LN gamma
            pl.BlockSpec((1, 1, HIDDEN), wmap),                    # ffn LN beta
        ],
        out_specs=pl.BlockSpec((1, S, HIDDEN), bmap),
        scratch_shapes=[pltpu.VMEM((S, HIDDEN), jnp.float32)],     # resident activation
        compiler_params=pltpu.CompilerParams(
            dimension_semantics=("parallel", "arbitrary")),
    )(x, mask,
      params["emb_ln_g"], params["emb_ln_b"],
      params["wqkv"], params["bqkv"], params["wo"], params["bo"],
      params["ln1_g"], params["ln1_b"],
      params["w1"], params["b1"], params["w2"], params["b2"],
      params["ln2_g"], params["ln2_b"])


# ---------------- parameters (deterministic init; stands in for pretrained weights) --
def init_params(key):
    def nrm(k, shape):
        return 0.02 * jax.random.normal(k, shape, jnp.float32)

    keys = iter(jax.random.split(key, 64))
    params = {
        "word_emb": nrm(next(keys), (VOCAB, HIDDEN)),
        "pos_emb": nrm(next(keys), (MAX_POS, HIDDEN)),
        "type_emb": nrm(next(keys), (TYPE_VOCAB, HIDDEN)),
        "emb_ln_g": jnp.ones((1, HIDDEN), jnp.float32),
        "emb_ln_b": jnp.zeros((1, HIDDEN), jnp.float32),
    }
    wqkv, wo, w1, w2 = [], [], [], []
    for _ in range(N_LAYERS):
        wq = nrm(next(keys), (HIDDEN, HIDDEN))
        wk = nrm(next(keys), (HIDDEN, HIDDEN))
        wv = nrm(next(keys), (HIDDEN, HIDDEN))
        wqkv.append(jnp.concatenate([wq, wk, wv], axis=1))
        wo.append(nrm(next(keys), (HIDDEN, HIDDEN)))
        w1.append(nrm(next(keys), (HIDDEN, INTERMEDIATE)))
        w2.append(nrm(next(keys), (INTERMEDIATE, HIDDEN)))
    params.update(
        wqkv=jnp.stack(wqkv).astype(jnp.bfloat16),
        bqkv=jnp.zeros((N_LAYERS, 1, 3 * HIDDEN), jnp.float32),
        wo=jnp.stack(wo).astype(jnp.bfloat16),
        bo=jnp.zeros((N_LAYERS, 1, HIDDEN), jnp.float32),
        ln1_g=jnp.ones((N_LAYERS, 1, HIDDEN), jnp.float32),
        ln1_b=jnp.zeros((N_LAYERS, 1, HIDDEN), jnp.float32),
        w1=jnp.stack(w1).astype(jnp.bfloat16),
        b1=jnp.zeros((N_LAYERS, 1, INTERMEDIATE), jnp.float32),
        w2=jnp.stack(w2).astype(jnp.bfloat16),
        b2=jnp.zeros((N_LAYERS, 1, HIDDEN), jnp.float32),
        ln2_g=jnp.ones((N_LAYERS, 1, HIDDEN), jnp.float32),
        ln2_b=jnp.zeros((N_LAYERS, 1, HIDDEN), jnp.float32),
        cls_w=nrm(next(keys), (HIDDEN, NUM_LABELS)),
        cls_b=jnp.zeros((NUM_LABELS,), jnp.float32),
    )
    return params


# ---------------- forward pass ----------------
def bert_for_text_classification(params, input_ids, attention_mask):
    B, S = input_ids.shape
    pos = jnp.arange(S)
    # embedding gathers are glue (plain JAX); token_type_ids fixed to 0
    x = (params["word_emb"][input_ids]
         + params["pos_emb"][pos][None, :, :]
         + params["type_emb"][0][None, None, :])                    # (B, S, H) f32
    mask = attention_mask.astype(jnp.float32).reshape(B, 1, S)

    last_hidden_state = encoder_stack(params, x, mask)              # (B, S, H)

    cls_output = last_hidden_state[:, 0, :]                         # outputs.last_hidden_state[:, 0, :]
    # classifier output is 3 lanes wide -> keep in plain XLA (lane-sparse for Pallas)
    logits = cls_output @ params["cls_w"] + params["cls_b"]
    return logits


if __name__ == "__main__":
    key = jax.random.PRNGKey(0)
    pkey, ikey = jax.random.split(key)
    params = init_params(pkey)

    B, S = 2, 8
    input_ids = jax.random.randint(ikey, (B, S), 1, VOCAB, dtype=jnp.int32)
    attention_mask = jnp.array(
        [[1, 1, 1, 1, 1, 1, 1, 1],
         [1, 1, 1, 1, 1, 1, 0, 0]], dtype=jnp.int32)

    fwd = jax.jit(functools.partial(bert_for_text_classification, params))
    logits = fwd(input_ids, attention_mask)
    jax.block_until_ready(logits)
    assert logits.shape == (B, NUM_LABELS)
    print("KERNEL_OK")
</pallas_src>

<mosaic_0001>
module attributes {stable_mosaic.version = 11 : i64} {
  func.func @_encoder_kernel(%arg0: i32, %arg1: i32, %arg2: memref<1x8x64xf32, #tpu.memory_space<vmem>>, %arg3: memref<1x1x8xf32, #tpu.memory_space<vmem>>, %arg4: memref<1x64xf32, #tpu.memory_space<vmem>>, %arg5: memref<1x64xf32, #tpu.memory_space<vmem>>, %arg6: memref<1x64x192xbf16, #tpu.memory_space<vmem>>, %arg7: memref<1x1x192xf32, #tpu.memory_space<vmem>>, %arg8: memref<1x64x64xbf16, #tpu.memory_space<vmem>>, %arg9: memref<1x1x64xf32, #tpu.memory_space<vmem>>, %arg10: memref<1x1x64xf32, #tpu.memory_space<vmem>>, %arg11: memref<1x1x64xf32, #tpu.memory_space<vmem>>, %arg12: memref<1x64x128xbf16, #tpu.memory_space<vmem>>, %arg13: memref<1x1x128xf32, #tpu.memory_space<vmem>>, %arg14: memref<1x128x64xbf16, #tpu.memory_space<vmem>>, %arg15: memref<1x1x64xf32, #tpu.memory_space<vmem>>, %arg16: memref<1x1x64xf32, #tpu.memory_space<vmem>>, %arg17: memref<1x1x64xf32, #tpu.memory_space<vmem>>, %arg18: memref<1x8x64xf32, #tpu.memory_space<vmem>>, %arg19: memref<8x64xf32, #tpu.memory_space<vmem>>) attributes {dimension_semantics = [#tpu.dimension_semantics<parallel>, #tpu.dimension_semantics<arbitrary>], iteration_bounds = array<i64: 2, 2>, scalar_prefetch = 0 : i64, scratch_operands = 1 : i64, tpu.core_type = #tpu.core_type<tc>, window_params = [{transform_indices = @transform_0, window_bounds = array<i64: 1, 8, 64>}, {transform_indices = @transform_1, window_bounds = array<i64: 1, 1, 8>}, {pipeline_mode = #tpu.pipeline_mode<synchronous>, transform_indices = @transform_2, window_bounds = array<i64: 1, 64>}, {pipeline_mode = #tpu.pipeline_mode<synchronous>, transform_indices = @transform_3, window_bounds = array<i64: 1, 64>}, {transform_indices = @transform_4, window_bounds = array<i64: 1, 64, 192>}, {transform_indices = @transform_5, window_bounds = array<i64: 1, 1, 192>}, {transform_indices = @transform_6, window_bounds = array<i64: 1, 64, 64>}, {transform_indices = @transform_7, window_bounds = array<i64: 1, 1, 64>}, {transform_indices = @transform_8, window_bounds = array<i64: 1, 1, 64>}, {transform_indices = @transform_9, window_bounds = array<i64: 1, 1, 64>}, {transform_indices = @transform_10, window_bounds = array<i64: 1, 64, 128>}, {transform_indices = @transform_11, window_bounds = array<i64: 1, 1, 128>}, {transform_indices = @transform_12, window_bounds = array<i64: 1, 128, 64>}, {transform_indices = @transform_13, window_bounds = array<i64: 1, 1, 64>}, {transform_indices = @transform_14, window_bounds = array<i64: 1, 1, 64>}, {transform_indices = @transform_15, window_bounds = array<i64: 1, 1, 64>}, {transform_indices = @transform_16, window_bounds = array<i64: 1, 8, 64>}]} {
    %c0_i32 = arith.constant 0 : i32
    %0 = arith.cmpi eq, %arg1, %c0_i32 : i32
    %1 = arith.extui %0 : i1 to i32
    %c0_i32_0 = arith.constant 0 : i32
    %2 = arith.cmpi ne, %1, %c0_i32_0 : i32
    scf.if %2 {
      %c0_75 = arith.constant 0 : index
      %c0_76 = arith.constant 0 : index
      %c0_77 = arith.constant 0 : index
      %158 = vector.load %arg2[%c0_75, %c0_76, %c0_77] : memref<1x8x64xf32, #tpu.memory_space<vmem>>, vector<1x8x64xf32>
      %159 = vector.shape_cast %158 : vector<1x8x64xf32> to vector<8x64xf32>
      %c0_78 = arith.constant 0 : index
      %c0_79 = arith.constant 0 : index
      %160 = vector.load %arg4[%c0_78, %c0_79] : memref<1x64xf32, #tpu.memory_space<vmem>>, vector<1x64xf32>
      %c0_80 = arith.constant 0 : index
      %c0_81 = arith.constant 0 : index
      %161 = vector.load %arg5[%c0_80, %c0_81] : memref<1x64xf32, #tpu.memory_space<vmem>>, vector<1x64xf32>
      %cst_82 = arith.constant dense<0.000000e+00> : vector<8xf32>
      %162 = vector.multi_reduction <add>, %159, %cst_82 [1] : vector<8x64xf32> to vector<8xf32>
      %163 = vector.shape_cast %162 : vector<8xf32> to vector<8x1xf32>
      %cst_83 = arith.constant 6.400000e+01 : f32
      %164 = vector.broadcast %cst_83 : f32 to vector<8x1xf32>
      %165 = arith.divf %163, %164 : vector<8x1xf32>
      %166 = vector.broadcast %165 : vector<8x1xf32> to vector<8x64xf32>
      %167 = arith.subf %159, %166 : vector<8x64xf32>
      %168 = arith.mulf %167, %167 : vector<8x64xf32>
      %cst_84 = arith.constant dense<0.000000e+00> : vector<8xf32>
      %169 = vector.multi_reduction <add>, %168, %cst_84 [1] : vector<8x64xf32> to vector<8xf32>
      %170 = vector.shape_cast %169 : vector<8xf32> to vector<8x1xf32>
      %cst_85 = arith.constant 6.400000e+01 : f32
      %171 = vector.broadcast %cst_85 : f32 to vector<8x1xf32>
      %172 = arith.divf %170, %171 : vector<8x1xf32>
      %173 = vector.broadcast %165 : vector<8x1xf32> to vector<8x64xf32>
      %174 = arith.subf %159, %173 : vector<8x64xf32>
      %cst_86 = arith.constant 9.99999996E-13 : f32
      %175 = vector.broadcast %cst_86 : f32 to vector<8x1xf32>
      %176 = arith.addf %172, %175 : vector<8x1xf32>
      %177 = math.rsqrt %176 : vector<8x1xf32>
      %178 = vector.broadcast %177 : vector<8x1xf32> to vector<8x64xf32>
      %179 = arith.mulf %174, %178 : vector<8x64xf32>
      %180 = vector.broadcast %160 : vector<1x64xf32> to vector<8x64xf32>
      %181 = arith.mulf %179, %180 : vector<8x64xf32>
      %182 = vector.broadcast %161 : vector<1x64xf32> to vector<8x64xf32>
      %183 = arith.addf %181, %182 : vector<8x64xf32>
      %c0_87 = arith.constant 0 : index
      %c0_88 = arith.constant 0 : index
      %184 = vector.load %arg19[%c0_87, %c0_88] : memref<8x64xf32, #tpu.memory_space<vmem>>, vector<8x64xf32>
      tpu.vector_store %arg19[%c0_87, %c0_88], %183 {strides = array<i32>} : memref<8x64xf32, #tpu.memory_space<vmem>>, vector<8x64xf32>,
    } else {
    }
    %c0 = arith.constant 0 : index
    %c0_1 = arith.constant 0 : index
    %3 = vector.load %arg19[%c0, %c0_1] : memref<8x64xf32, #tpu.memory_space<vmem>>, vector<8x64xf32>
    %4 = arith.truncf %3 : vector<8x64xf32> to vector<8x64xbf16>
    %c0_2 = arith.constant 0 : index
    %c0_3 = arith.constant 0 : index
    %c0_4 = arith.constant 0 : index
    %5 = vector.load %arg6[%c0_2, %c0_3, %c0_4] : memref<1x64x192xbf16, #tpu.memory_space<vmem>>, vector<1x64x192xbf16>
    %6 = vector.shape_cast %5 : vector<1x64x192xbf16> to vector<64x192xbf16>
    %cst = arith.constant dense<0.000000e+00> : vector<8x192xf32>
    %7 = tpu.matmul %4, %6, %cst {dimension_numbers = #tpu.dot_dimension_numbers<[1], [0], [0], [1], [0, 0, 1, 1], [], []>} : vector<8x64xbf16>, vector<64x192xbf16>, vector<8x192xf32> -> vector<8x192xf32>
    %c0_5 = arith.constant 0 : index
    %c0_6 = arith.constant 0 : index
    %c0_7 = arith.constant 0 : index
    %8 = vector.load %arg7[%c0_5, %c0_6, %c0_7] : memref<1x1x192xf32, #tpu.memory_space<vmem>>, vector<1x1x192xf32>
    %9 = vector.shape_cast %8 : vector<1x1x192xf32> to vector<1x192xf32>
    %10 = vector.broadcast %9 : vector<1x192xf32> to vector<8x192xf32>
    %11 = arith.addf %7, %10 : vector<8x192xf32>
    %c0_8 = arith.constant 0 : index
    %c0_9 = arith.constant 0 : index
    %c0_10 = arith.constant 0 : index
    %12 = vector.load %arg3[%c0_8, %c0_9, %c0_10] : memref<1x1x8xf32, #tpu.memory_space<vmem>>, vector<1x1x8xf32>
    %13 = vector.shape_cast %12 : vector<1x1x8xf32> to vector<1x8xf32>
    %cst_11 = arith.constant 1.000000e+00 : f32
    %14 = vector.broadcast %cst_11 : f32 to vector<1x8xf32>
    %15 = arith.subf %14, %13 : vector<1x8xf32>
    %cst_12 = arith.constant -1.000000e+09 : f32
    %16 = vector.broadcast %cst_12 : f32 to vector<1x8xf32>
    %17 = arith.mulf %15, %16 : vector<1x8xf32>
    %18 = vector.extract_strided_slice %11 {offsets = [0, 0], sizes = [8, 32], strides = [1, 1]} : vector<8x192xf32> to vector<8x32xf32>
    %19 = arith.truncf %18 : vector<8x32xf32> to vector<8x32xbf16>
    %20 = vector.extract_strided_slice %11 {offsets = [0, 64], sizes = [8, 32], strides = [1, 1]} : vector<8x192xf32> to vector<8x32xf32>
    %21 = arith.truncf %20 : vector<8x32xf32> to vector<8x32xbf16>
    %22 = vector.extract_strided_slice %11 {offsets = [0, 128], sizes = [8, 32], strides = [1, 1]} : vector<8x192xf32> to vector<8x32xf32>
    %23 = arith.truncf %22 : vector<8x32xf32> to vector<8x32xbf16>
    %cst_13 = arith.constant dense<0.000000e+00> : vector<8x8xf32>
    %24 = tpu.matmul %19, %21, %cst_13 {dimension_numbers = #tpu.dot_dimension_numbers<[1], [1], [0], [0], [0, 0, 1, 0], [], []>} : vector<8x32xbf16>, vector<8x32xbf16>, vector<8x8xf32> -> vector<8x8xf32>
    %cst_14 = arith.constant 0.176776692 : f32
    %25 = vector.broadcast %cst_14 : f32 to vector<8x8xf32>
    %26 = arith.mulf %24, %25 : vector<8x8xf32>
    %27 = vector.broadcast %17 : vector<1x8xf32> to vector<8x8xf32>
    %28 = arith.addf %26, %27 : vector<8x8xf32>
    %cst_15 = arith.constant dense<0xFF800000> : vector<8xf32>
    %29 = vector.multi_reduction <maximumf>, %28, %cst_15 [1] : vector<8x8xf32> to vector<8xf32>
    %30 = vector.shape_cast %29 : vector<8xf32> to vector<8x1xf32>
    %31 = vector.broadcast %30 : vector<8x1xf32> to vector<8x8xf32>
    %32 = arith.subf %28, %31 : vector<8x8xf32>
    %33 = math.exp %32 : vector<8x8xf32>
    %cst_16 = arith.constant dense<0.000000e+00> : vector<8xf32>
    %34 = vector.multi_reduction <add>, %33, %cst_16 [1] : vector<8x8xf32> to vector<8xf32>
    %35 = vector.shape_cast %34 : vector<8xf32> to vector<8x1xf32>
    %36 = vector.broadcast %35 : vector<8x1xf32> to vector<8x8xf32>
    %37 = arith.divf %33, %36 : vector<8x8xf32>
    %38 = arith.truncf %37 : vector<8x8xf32> to vector<8x8xbf16>
    %cst_17 = arith.constant dense<0.000000e+00> : vector<8x32xf32>
    %39 = tpu.matmul %38, %23, %cst_17 {dimension_numbers = #tpu.dot_dimension_numbers<[1], [0], [0], [1], [0, 0, 1, 1], [], []>} : vector<8x8xbf16>, vector<8x32xbf16>, vector<8x32xf32> -> vector<8x32xf32>
    %40 = vector.extract_strided_slice %11 {offsets = [0, 32], sizes = [8, 32], strides = [1, 1]} : vector<8x192xf32> to vector<8x32xf32>
    %41 = arith.truncf %40 : vector<8x32xf32> to vector<8x32xbf16>
    %42 = vector.extract_strided_slice %11 {offsets = [0, 96], sizes = [8, 32], strides = [1, 1]} : vector<8x192xf32> to vector<8x32xf32>
    %43 = arith.truncf %42 : vector<8x32xf32> to vector<8x32xbf16>
    %44 = vector.extract_strided_slice %11 {offsets = [0, 160], sizes = [8, 32], strides = [1, 1]} : vector<8x192xf32> to vector<8x32xf32>
    %45 = arith.truncf %44 : vector<8x32xf32> to vector<8x32xbf16>
    %cst_18 = arith.constant dense<0.000000e+00> : vector<8x8xf32>
    %46 = tpu.matmul %41, %43, %cst_18 {dimension_numbers = #tpu.dot_dimension_numbers<[1], [1], [0], [0], [0, 0, 1, 0], [], []>} : vector<8x32xbf16>, vector<8x32xbf16>, vector<8x8xf32> -> vector<8x8xf32>
    %cst_19 = arith.constant 0.176776692 : f32
    %47 = vector.broadcast %cst_19 : f32 to vector<8x8xf32>
    %48 = arith.mulf %46, %47 : vector<8x8xf32>
    %49 = vector.broadcast %17 : vector<1x8xf32> to vector<8x8xf32>
    %50 = arith.addf %48, %49 : vector<8x8xf32>
    %cst_20 = arith.constant dense<0xFF800000> : vector<8xf32>
    %51 = vector.multi_reduction <maximumf>, %50, %cst_20 [1] : vector<8x8xf32> to vector<8xf32>
    %52 = vector.shape_cast %51 : vector<8xf32> to vector<8x1xf32>
    %53 = vector.broadcast %52 : vector<8x1xf32> to vector<8x8xf32>
    %54 = arith.subf %50, %53 : vector<8x8xf32>
    %55 = math.exp %54 : vector<8x8xf32>
    %cst_21 = arith.constant dense<0.000000e+00> : vector<8xf32>
    %56 = vector.multi_reduction <add>, %55, %cst_21 [1] : vector<8x8xf32> to vector<8xf32>
    %57 = vector.shape_cast %56 : vector<8xf32> to vector<8x1xf32>
    %58 = vector.broadcast %57 : vector<8x1xf32> to vector<8x8xf32>
    %59 = arith.divf %55, %58 : vector<8x8xf32>
    %60 = arith.truncf %59 : vector<8x8xf32> to vector<8x8xbf16>
    %cst_22 = arith.constant dense<0.000000e+00> : vector<8x32xf32>
    %61 = tpu.matmul %60, %45, %cst_22 {dimension_numbers = #tpu.dot_dimension_numbers<[1], [0], [0], [1], [0, 0, 1, 1], [], []>} : vector<8x8xbf16>, vector<8x32xbf16>, vector<8x32xf32> -> vector<8x32xf32>
    %62 = tpu.concatenate %39, %61 in 1 : vector<8x32xf32>, vector<8x32xf32> -> vector<8x64xf32>
    %63 = arith.truncf %62 : vector<8x64xf32> to vector<8x64xbf16>
    %c0_23 = arith.constant 0 : index
    %c0_24 = arith.constant 0 : index
    %c0_25 = arith.constant 0 : index
    %64 = vector.load %arg8[%c0_23, %c0_24, %c0_25] : memref<1x64x64xbf16, #tpu.memory_space<vmem>>, vector<1x64x64xbf16>
    %65 = vector.shape_cast %64 : vector<1x64x64xbf16> to vector<64x64xbf16>
    %cst_26 = arith.constant dense<0.000000e+00> : vector<8x64xf32>
    %66 = tpu.matmul %63, %65, %cst_26 {dimension_numbers = #tpu.dot_dimension_numbers<[1], [0], [0], [1], [0, 0, 1, 1], [], []>} : vector<8x64xbf16>, vector<64x64xbf16>, vector<8x64xf32> -> vector<8x64xf32>
    %c0_27 = arith.constant 0 : index
    %c0_28 = arith.constant 0 : index
    %c0_29 = arith.constant 0 : index
    %67 = vector.load %arg9[%c0_27, %c0_28, %c0_29] : memref<1x1x64xf32, #tpu.memory_space<vmem>>, vector<1x1x64xf32>
    %68 = vector.shape_cast %67 : vector<1x1x64xf32> to vector<1x64xf32>
    %69 = vector.broadcast %68 : vector<1x64xf32> to vector<8x64xf32>
    %70 = arith.addf %66, %69 : vector<8x64xf32>
    %71 = arith.addf %70, %3 : vector<8x64xf32>
    %c0_30 = arith.constant 0 : index
    %c0_31 = arith.constant 0 : index
    %c0_32 = arith.constant 0 : index
    %72 = vector.load %arg10[%c0_30, %c0_31, %c0_32] : memref<1x1x64xf32, #tpu.memory_space<vmem>>, vector<1x1x64xf32>
    %73 = vector.shape_cast %72 : vector<1x1x64xf32> to vector<1x64xf32>
    %c0_33 = arith.constant 0 : index
    %c0_34 = arith.constant 0 : index
    %c0_35 = arith.constant 0 : index
    %74 = vector.load %arg11[%c0_33, %c0_34, %c0_35] : memref<1x1x64xf32, #tpu.memory_space<vmem>>, vector<1x1x64xf32>
    %75 = vector.shape_cast %74 : vector<1x1x64xf32> to vector<1x64xf32>
    %cst_36 = arith.constant dense<0.000000e+00> : vector<8xf32>
    %76 = vector.multi_reduction <add>, %71, %cst_36 [1] : vector<8x64xf32> to vector<8xf32>
    %77 = vector.shape_cast %76 : vector<8xf32> to vector<8x1xf32>
    %cst_37 = arith.constant 6.400000e+01 : f32
    %78 = vector.broadcast %cst_37 : f32 to vector<8x1xf32>
    %79 = arith.divf %77, %78 : vector<8x1xf32>
    %80 = vector.broadcast %79 : vector<8x1xf32> to vector<8x64xf32>
    %81 = arith.subf %71, %80 : vector<8x64xf32>
    %82 = arith.mulf %81, %81 : vector<8x64xf32>
    %cst_38 = arith.constant dense<0.000000e+00> : vector<8xf32>
    %83 = vector.multi_reduction <add>, %82, %cst_38 [1] : vector<8x64xf32> to vector<8xf32>
    %84 = vector.shape_cast %83 : vector<8xf32> to vector<8x1xf32>
    %cst_39 = arith.constant 6.400000e+01 : f32
    %85 = vector.broadcast %cst_39 : f32 to vector<8x1xf32>
    %86 = arith.divf %84, %85 : vector<8x1xf32>
    %87 = vector.broadcast %79 : vector<8x1xf32> to vector<8x64xf32>
    %88 = arith.subf %71, %87 : vector<8x64xf32>
    %cst_40 = arith.constant 9.99999996E-13 : f32
    %89 = vector.broadcast %cst_40 : f32 to vector<8x1xf32>
    %90 = arith.addf %86, %89 : vector<8x1xf32>
    %91 = math.rsqrt %90 : vector<8x1xf32>
    %92 = vector.broadcast %91 : vector<8x1xf32> to vector<8x64xf32>
    %93 = arith.mulf %88, %92 : vector<8x64xf32>
    %94 = vector.broadcast %73 : vector<1x64xf32> to vector<8x64xf32>
    %95 = arith.mulf %93, %94 : vector<8x64xf32>
    %96 = vector.broadcast %75 : vector<1x64xf32> to vector<8x64xf32>
    %97 = arith.addf %95, %96 : vector<8x64xf32>
    %98 = arith.truncf %97 : vector<8x64xf32> to vector<8x64xbf16>
    %c0_41 = arith.constant 0 : index
    %c0_42 = arith.constant 0 : index
    %c0_43 = arith.constant 0 : index
    %99 = vector.load %arg12[%c0_41, %c0_42, %c0_43] : memref<1x64x128xbf16, #tpu.memory_space<vmem>>, vector<1x64x128xbf16>
    %100 = vector.shape_cast %99 : vector<1x64x128xbf16> to vector<64x128xbf16>
    %cst_44 = arith.constant dense<0.000000e+00> : vector<8x128xf32>
    %101 = tpu.matmul %98, %100, %cst_44 {dimension_numbers = #tpu.dot_dimension_numbers<[1], [0], [0], [1], [0, 0, 1, 1], [], []>} : vector<8x64xbf16>, vector<64x128xbf16>, vector<8x128xf32> -> vector<8x128xf32>
    %c0_45 = arith.constant 0 : index
    %c0_46 = arith.constant 0 : index
    %c0_47 = arith.constant 0 : index
    %102 = vector.load %arg13[%c0_45, %c0_46, %c0_47] : memref<1x1x128xf32, #tpu.memory_space<vmem>>, vector<1x1x128xf32>
    %103 = vector.shape_cast %102 : vector<1x1x128xf32> to vector<1x128xf32>
    %104 = vector.broadcast %103 : vector<1x128xf32> to vector<8x128xf32>
    %105 = arith.addf %101, %104 : vector<8x128xf32>
    %cst_48 = arith.constant 5.000000e-01 : f32
    %106 = vector.broadcast %cst_48 : f32 to vector<8x128xf32>
    %107 = arith.mulf %106, %105 : vector<8x128xf32>
    %cst_49 = arith.constant 4.471500e-02 : f32
    %108 = vector.broadcast %cst_49 : f32 to vector<8x128xf32>
    %109 = arith.mulf %108, %105 : vector<8x128xf32>
    %110 = arith.mulf %109, %105 : vector<8x128xf32>
    %111 = arith.mulf %110, %105 : vector<8x128xf32>
    %112 = arith.addf %105, %111 : vector<8x128xf32>
    %cst_50 = arith.constant 0.797884583 : f32
    %113 = vector.broadcast %cst_50 : f32 to vector<8x128xf32>
    %114 = arith.mulf %113, %112 : vector<8x128xf32>
    %115 = math.tanh %114 : vector<8x128xf32>
    %cst_51 = arith.constant 1.000000e+00 : f32
    %116 = vector.broadcast %cst_51 : f32 to vector<8x128xf32>
    %117 = arith.addf %116, %115 : vector<8x128xf32>
    %118 = arith.mulf %107, %117 : vector<8x128xf32>
    %119 = arith.truncf %118 : vector<8x128xf32> to vector<8x128xbf16>
    %c0_52 = arith.constant 0 : index
    %c0_53 = arith.constant 0 : index
    %c0_54 = arith.constant 0 : index
    %120 = vector.load %arg14[%c0_52, %c0_53, %c0_54] : memref<1x128x64xbf16, #tpu.memory_space<vmem>>, vector<1x128x64xbf16>
    %121 = vector.shape_cast %120 : vector<1x128x64xbf16> to vector<128x64xbf16>
    %cst_55 = arith.constant dense<0.000000e+00> : vector<8x64xf32>
    %122 = tpu.matmul %119, %121, %cst_55 {dimension_numbers = #tpu.dot_dimension_numbers<[1], [0], [0], [1], [0, 0, 1, 1], [], []>} : vector<8x128xbf16>, vector<128x64xbf16>, vector<8x64xf32> -> vector<8x64xf32>
    %c0_56 = arith.constant 0 : index
    %c0_57 = arith.constant 0 : index
    %c0_58 = arith.constant 0 : index
    %123 = vector.load %arg15[%c0_56, %c0_57, %c0_58] : memref<1x1x64xf32, #tpu.memory_space<vmem>>, vector<1x1x64xf32>
    %124 = vector.shape_cast %123 : vector<1x1x64xf32> to vector<1x64xf32>
    %125 = vector.broadcast %124 : vector<1x64xf32> to vector<8x64xf32>
    %126 = arith.addf %122, %125 : vector<8x64xf32>
    %127 = arith.addf %126, %97 : vector<8x64xf32>
    %c0_59 = arith.constant 0 : index
    %c0_60 = arith.constant 0 : index
    %c0_61 = arith.constant 0 : index
    %128 = vector.load %arg16[%c0_59, %c0_60, %c0_61] : memref<1x1x64xf32, #tpu.memory_space<vmem>>, vector<1x1x64xf32>
    %129 = vector.shape_cast %128 : vector<1x1x64xf32> to vector<1x64xf32>
    %c0_62 = arith.constant 0 : index
    %c0_63 = arith.constant 0 : index
    %c0_64 = arith.constant 0 : index
    %130 = vector.load %arg17[%c0_62, %c0_63, %c0_64] : memref<1x1x64xf32, #tpu.memory_space<vmem>>, vector<1x1x64xf32>
    %131 = vector.shape_cast %130 : vector<1x1x64xf32> to vector<1x64xf32>
    %cst_65 = arith.constant dense<0.000000e+00> : vector<8xf32>
    %132 = vector.multi_reduction <add>, %127, %cst_65 [1] : vector<8x64xf32> to vector<8xf32>
    %133 = vector.shape_cast %132 : vector<8xf32> to vector<8x1xf32>
    %cst_66 = arith.constant 6.400000e+01 : f32
    %134 = vector.broadcast %cst_66 : f32 to vector<8x1xf32>
    %135 = arith.divf %133, %134 : vector<8x1xf32>
    %136 = vector.broadcast %135 : vector<8x1xf32> to vector<8x64xf32>
    %137 = arith.subf %127, %136 : vector<8x64xf32>
    %138 = arith.mulf %137, %137 : vector<8x64xf32>
    %cst_67 = arith.constant dense<0.000000e+00> : vector<8xf32>
    %139 = vector.multi_reduction <add>, %138, %cst_67 [1] : vector<8x64xf32> to vector<8xf32>
    %140 = vector.shape_cast %139 : vector<8xf32> to vector<8x1xf32>
    %cst_68 = arith.constant 6.400000e+01 : f32
    %141 = vector.broadcast %cst_68 : f32 to vector<8x1xf32>
    %142 = arith.divf %140, %141 : vector<8x1xf32>
    %143 = vector.broadcast %135 : vector<8x1xf32> to vector<8x64xf32>
    %144 = arith.subf %127, %143 : vector<8x64xf32>
    %cst_69 = arith.constant 9.99999996E-13 : f32
    %145 = vector.broadcast %cst_69 : f32 to vector<8x1xf32>
    %146 = arith.addf %142, %145 : vector<8x1xf32>
    %147 = math.rsqrt %146 : vector<8x1xf32>
    %148 = vector.broadcast %147 : vector<8x1xf32> to vector<8x64xf32>
    %149 = arith.mulf %144, %148 : vector<8x64xf32>
    %150 = vector.broadcast %129 : vector<1x64xf32> to vector<8x64xf32>
    %151 = arith.mulf %149, %150 : vector<8x64xf32>
    %152 = vector.broadcast %131 : vector<1x64xf32> to vector<8x64xf32>
    %153 = arith.addf %151, %152 : vector<8x64xf32>
    %c0_70 = arith.constant 0 : index
    %c0_71 = arith.constant 0 : index
    %154 = vector.load %arg19[%c0_70, %c0_71] : memref<8x64xf32, #tpu.memory_space<vmem>>, vector<8x64xf32>
    tpu.vector_store %arg19[%c0_70, %c0_71], %153 {strides = array<i32>} : memref<8x64xf32, #tpu.memory_space<vmem>>, vector<8x64xf32>,
    %c0_72 = arith.constant 0 : index
    %c0_73 = arith.constant 0 : index
    %c0_74 = arith.constant 0 : index
    %155 = vector.load %arg18[%c0_72, %c0_73, %c0_74] : memref<1x8x64xf32, #tpu.memory_space<vmem>>, vector<1x8x64xf32>
    %156 = vector.shape_cast %155 : vector<1x8x64xf32> to vector<8x64xf32>
    %157 = vector.shape_cast %153 : vector<8x64xf32> to vector<1x8x64xf32>
    tpu.vector_store %arg18[%c0_72, %c0_73, %c0_74], %157 {strides = array<i32>} : memref<1x8x64xf32, #tpu.memory_space<vmem>>, vector<1x8x64xf32>,
    return
  }
  func.func @transform_0(%arg0: i32, %arg1: i32) -> (i32, i32, i32) {
    %c0_i32 = arith.constant 0 : i32
    %c0_i32_0 = arith.constant 0 : i32
    %c0_i32_1 = arith.constant 0 : i32
    return %arg0, %c0_i32, %c0_i32_0 : i32, i32, i32
  }
  func.func @transform_1(%arg0: i32, %arg1: i32) -> (i32, i32, i32) {
    %c0_i32 = arith.constant 0 : i32
    %c0_i32_0 = arith.constant 0 : i32
    %c0_i32_1 = arith.constant 0 : i32
    return %arg0, %c0_i32, %c0_i32_0 : i32, i32, i32
  }
  func.func @transform_2(%arg0: i32, %arg1: i32) -> (i32, i32) {
    %c0_i32 = arith.constant 0 : i32
    %c0_i32_0 = arith.constant 0 : i32
    %c0_i32_1 = arith.constant 0 : i32
    return %c0_i32, %c0_i32_0 : i32, i32
  }
  func.func @transform_3(%arg0: i32, %arg1: i32) -> (i32, i32) {
    %c0_i32 = arith.constant 0 : i32
    %c0_i32_0 = arith.constant 0 : i32
    %c0_i32_1 = arith.constant 0 : i32
    return %c0_i32, %c0_i32_0 : i32, i32
  }
  func.func @transform_4(%arg0: i32, %arg1: i32) -> (i32, i32, i32) {
    %c0_i32 = arith.constant 0 : i32
    %c0_i32_0 = arith.constant 0 : i32
    %c0_i32_1 = arith.constant 0 : i32
    return %arg1, %c0_i32, %c0_i32_0 : i32, i32, i32
  }
  func.func @transform_5(%arg0: i32, %arg1: i32) -> (i32, i32, i32) {
    %c0_i32 = arith.constant 0 : i32
    %c0_i32_0 = arith.constant 0 : i32
    %c0_i32_1 = arith.constant 0 : i32
    return %arg1, %c0_i32, %c0_i32_0 : i32, i32, i32
  }
  func.func @transform_6(%arg0: i32, %arg1: i32) -> (i32, i32, i32) {
    %c0_i32 = arith.constant 0 : i32
    %c0_i32_0 = arith.constant 0 : i32
    %c0_i32_1 = arith.constant 0 : i32
    return %arg1, %c0_i32, %c0_i32_0 : i32, i32, i32
  }
  func.func @transform_7(%arg0: i32, %arg1: i32) -> (i32, i32, i32) {
    %c0_i32 = arith.constant 0 : i32
    %c0_i32_0 = arith.constant 0 : i32
    %c0_i32_1 = arith.constant 0 : i32
    return %arg1, %c0_i32, %c0_i32_0 : i32, i32, i32
  }
  func.func @transform_8(%arg0: i32, %arg1: i32) -> (i32, i32, i32) {
    %c0_i32 = arith.constant 0 : i32
    %c0_i32_0 = arith.constant 0 : i32
    %c0_i32_1 = arith.constant 0 : i32
    return %arg1, %c0_i32, %c0_i32_0 : i32, i32, i32
  }
  func.func @transform_9(%arg0: i32, %arg1: i32) -> (i32, i32, i32) {
    %c0_i32 = arith.constant 0 : i32
    %c0_i32_0 = arith.constant 0 : i32
    %c0_i32_1 = arith.constant 0 : i32
    return %arg1, %c0_i32, %c0_i32_0 : i32, i32, i32
  }
  func.func @transform_10(%arg0: i32, %arg1: i32) -> (i32, i32, i32) {
    %c0_i32 = arith.constant 0 : i32
    %c0_i32_0 = arith.constant 0 : i32
    %c0_i32_1 = arith.constant 0 : i32
    return %arg1, %c0_i32, %c0_i32_0 : i32, i32, i32
  }
  func.func @transform_11(%arg0: i32, %arg1: i32) -> (i32, i32, i32) {
    %c0_i32 = arith.constant 0 : i32
    %c0_i32_0 = arith.constant 0 : i32
    %c0_i32_1 = arith.constant 0 : i32
    return %arg1, %c0_i32, %c0_i32_0 : i32, i32, i32
  }
  func.func @transform_12(%arg0: i32, %arg1: i32) -> (i32, i32, i32) {
    %c0_i32 = arith.constant 0 : i32
    %c0_i32_0 = arith.constant 0 : i32
    %c0_i32_1 = arith.constant 0 : i32
    return %arg1, %c0_i32, %c0_i32_0 : i32, i32, i32
  }
  func.func @transform_13(%arg0: i32, %arg1: i32) -> (i32, i32, i32) {
    %c0_i32 = arith.constant 0 : i32
    %c0_i32_0 = arith.constant 0 : i32
    %c0_i32_1 = arith.constant 0 : i32
    return %arg1, %c0_i32, %c0_i32_0 : i32, i32, i32
  }
  func.func @transform_14(%arg0: i32, %arg1: i32) -> (i32, i32, i32) {
    %c0_i32 = arith.constant 0 : i32
    %c0_i32_0 = arith.constant 0 : i32
    %c0_i32_1 = arith.constant 0 : i32
    return %arg1, %c0_i32, %c0_i32_0 : i32, i32, i32
  }
  func.func @transform_15(%arg0: i32, %arg1: i32) -> (i32, i32, i32) {
    %c0_i32 = arith.constant 0 : i32
    %c0_i32_0 = arith.constant 0 : i32
    %c0_i32_1 = arith.constant 0 : i32
    return %arg1, %c0_i32, %c0_i32_0 : i32, i32, i32
  }
  func.func @transform_16(%arg0: i32, %arg1: i32) -> (i32, i32, i32) {
    %c0_i32 = arith.constant 0 : i32
    %c0_i32_0 = arith.constant 0 : i32
    %c0_i32_1 = arith.constant 0 : i32
    return %arg0, %c0_i32, %c0_i32_0 : i32, i32, i32
  }
}

</mosaic_0001>

<bundles_post_ra>
// kernel: bert_for_text_classification.1
= control target key start
LH: loop header
LB: loop body
LE: loop exit
PB: predicated region body
PF: predicated region fallthrough
CT: control target
= control target key end

     0   :  { %s2457_s0 = inlined_call_operand.vmem [shape: f32[2,8,64], index: 0, kind: input, shape index: {}]   ;;  %s2458_s1 = inlined_call_operand.vmem [shape: f32[2,1,8], index: 1, kind: input, shape index: {}]   ;;  %s2459_s2 = inlined_call_operand.vmem [shape: f32[1,64], index: 2, kind: input, shape index: {}]   ;;  %s2460_s3 = inlined_call_operand.vmem [shape: f32[1,64], index: 3, kind: input, shape index: {}]   ;;  %s2461_s4 = inlined_call_operand.hbm [shape: bf16[2,64,192], index: 4, kind: input, shape index: {}]   ;;  %s2462_s5 = inlined_call_operand.vmem [shape: f32[2,1,192], index: 5, kind: input, shape index: {}]   ;;  %s2463_s6 = inlined_call_operand.hbm [shape: bf16[2,64,64], index: 6, kind: input, shape index: {}]   ;;  %s2464_s7 = inlined_call_operand.vmem [shape: f32[2,1,64], index: 7, kind: input, shape index: {}, may-alias: {7,9,13,15}]   ;;  %s2465_s8 = inlined_call_operand.vmem [shape: f32[2,1,64], index: 8, kind: input, shape index: {}, may-alias: {8,14}]   ;;  %s2466_s9 = inlined_call_operand.vmem [shape: f32[2,1,64], index: 9, kind: input, shape index: {}, may-alias: {7,9,13,15}]   ;;  %s2467_s10 = inlined_call_operand.hbm [shape: bf16[2,64,128], index: 10, kind: input, shape index: {}]   ;;  %s2468_s11 = inlined_call_operand.vmem [shape: f32[2,1,128], index: 11, kind: input, shape index: {}]   ;;  %s2469_s12 = inlined_call_operand.vmem [shape: bf16[2,128,64], index: 12, kind: input, shape index: {}]   ;;  %s2470_s13 = inlined_call_operand.vmem [shape: f32[2,1,64], index: 13, kind: input, shape index: {}, may-alias: {7,9,13,15}]   ;;  %s2471_s14 = inlined_call_operand.vmem [shape: f32[2,1,64], index: 14, kind: input, shape index: {}, may-alias: {8,14}]   ;;  %s2472_s15 = inlined_call_operand.vmem [shape: f32[2,1,64], index: 15, kind: input, shape index: {}, may-alias: {7,9,13,15}]   ;;  %s2473_s16 = inlined_call_operand.vmem [shape: f32[2,8,64], index: 16, kind: output, shape index: {}]  }
   0x1   :  { %2481 = sst [smem:[#allocation18_spill]] %s2457_s0 }
   0x2   :  { %2482 = sst [smem:[#allocation19_spill]] %s2459_s2 }
   0x3   :  { %2483 = sst [smem:[#allocation20_spill]] %s2460_s3 }
   0x4   :  { %2484 = sst [smem:[#allocation21_spill]] %s2461_s4 }
   0x5   :  { %2485 = sst [smem:[#allocation22_spill]] %s2462_s5 }
   0x6   :  { %2486 = sst [smem:[#allocation23_spill]] %s2463_s6 }
   0x7   :  { %2487 = sst [smem:[#allocation24_spill]] %s2464_s7 }
   0x8   :  { %2488 = sst [smem:[#allocation25_spill]] %s2465_s8 }
   0x9   :  { %2489 = sst [smem:[#allocation26_spill]] %s2466_s9 }
   0xa   :  { %2490 = sst [smem:[#allocation27_spill]] %s2467_s10 }
   0xb   :  { %2491 = sst [smem:[#allocation28_spill]] %s2468_s11 }
   0xc   :  { %2492 = sst [smem:[#allocation29_spill]] %s2469_s12 }
   0xd   :  { %2493 = sst [smem:[#allocation30_spill]] %s2470_s13 }
   0xe   :  { %2494 = sst [smem:[#allocation31_spill]] %s2471_s14 }
   0xf   :  { %2495 = sst [smem:[#allocation32_spill]] %s2472_s15 }
  0x10   :  { %2496 = sst [smem:[#allocation33_spill]] %s2473_s16 }
  0x11   :  { %21 = vsyncpa [#allocation4], 0 }
  0x12   :  { %23 = vsyncpa [#allocation4 + $0x1], 0 }
  0x13   :  { %24 = vsyncpa [#allocation6], 0 }
  0x14   :  { %26 = vsyncpa [#allocation6 + $0x1], 0  ;;  %s2121_s21 = smov 0   ;;  %s2123_s22 = smov 0  }
  0x15   :  { %s2125_s23 = smov 0   ;;  %s2127_s24 = smov 0  }
  0x16   :  { %s2129_s25 = smov 0   ;;  %s2131_s26 = smov 0  }
  0x17   :  { %s2133_s27 = smov 0   ;;  %s2135_s28 = smov 0  }
  0x18 LB: > { %2497 = sst [smem:[#allocation10_spill]] %s2001_s22  ;;  %s2476_s29 = sadd.s32 4294967295, %s2025_s28   ;;  %s2025_s28 = sphi %s2135_s28, %s32_s28   ;;  %s2021_s27 = sphi %s2133_s27, %s2544_s27   ;;  %s2017_s26 = sphi %s2131_s26, %s2543_s26   ;;  %s2013_s25 = sphi %s2129_s25, %s2542_s25   ;;  %s2009_s24 = sphi %s2127_s24, %s2541_s24   ;;  %s2005_s23 = sphi %s2125_s23, %s2540_s23   ;;  %s2001_s22 = sphi %s2123_s22, %s2539_s22   ;;  %s1997_s21 = sphi %s2121_s21, %s2538_s21  }
  0x19   : > { %2498 = sst [smem:[#allocation11_spill]] %s2005_s23  ;;  %s41_s30 = sadd.s32 1, %s2017_s26 }
  0x1a   : > { %2499 = sst [smem:[#allocation12_spill]] %s2017_s26  ;;  %p42_p0 = scmp.ge.s32.totalorder %s41_s30, 2 }
  0x1b   : > { %2500 = sst [smem:[#allocation13_spill]] %s2021_s27  ;;  %s44_s0 = sadd.s32 1, %s2021_s27 }
  0x1c   : > { %2501 = sst [smem:[#allocation14_spill]] %s2025_s28  ;;  %s145_s17 = sadd.s32 1, %s2005_s23 }
  0x1d   : > { %p152_p1 = scmp.ne.s32.totalorder %s2005_s23, %s2001_s22  ;;  %s2546_s30 = smov (%p42_p0, %s41_s30), 0 }
  0x1e   : > { %2502 = sst [smem:[#allocation15_spill]] %s2546_s30  ;;  %s2548_s0 = smov (!%p42_p0, %s44_s0), %s2021_s27 }
  0x1f   : > { %s142_s18 = ssub.s32 %s2017_s26, %s2546_s30  ;;  %p153_p2 = scmp.eq.s32.totalorder %s2025_s28, 0 }
  0x20   : > { %p46_p3 = scmp.ge.s32.totalorder %s2548_s0, 2  ;;  %p143_p4 = scmp.eq.s32.totalorder %s142_s18, 0 }
  0x21   : > { %p154_p5 = por %p153_p2, %p152_p1  ;;  %p158_p6 = scmp.ne.s32.totalorder %s2001_s22, %s1997_s21 }
  0x22   : > { %s2550_s0 = smov (%p46_p3, %s2548_s0), 0  ;;  %p159_p7 = scmp.eq.s32.totalorder %s2476_s29, 0 }
  0x23   : > { %2503 = sst [smem:[#allocation16_spill]] %s2550_s0  ;;  %p1762_p8 = scmp.lt.s32.totalorder %s2025_s28, 4 }
  0x24   : > { %s2175_s19 = scalar_select %p143_p4, %s2005_s23, %s145_s17  }
  0x25   : > { %s2181_s20 = sand.u32 1, %s2005_s23   ;;  %p2183_p9 = por %p159_p7, %p158_p6 }
  0x26   : > { %2504 = sst [smem:[#allocation17_spill]] %s2175_s19  ;;  %s542_s30 = sand.u32 1, %s2025_s28  }
  0x27   : > { %p2188_p10 = pnand %p1762_p8, %p154_p5  ;;  %s1596_s21 = sshll.u32 %s2181_s20, 5 }
  0x28   : > { %s1719_s18 = sshll.u32 %s2017_s26, 5  ;;  %s2507_s6 = sld [smem:[#allocation23_spill]] }
  0x29   : > { %s546_s19 = scalar_lea.vmem [#allocation5], %s1596_s21  ;;  %s2197_s16 = scalar_lea.sflag [#allocation6], %s542_s30 }
  0x2a   : > { %s554_s23 = sshll.u32 %s546_s19, 4  ;;  %s2027_s15 = smov 64   ;;  %s555_s23 = int_to_ptr.vmem [resolvable:$true] %s554_s23 }
  0x2b   : > { %s2028_s14 = smov 4   ;;  %s2508_s10 = sld [smem:[#allocation27_spill]] }
  0x2c   : > { %s586_s17 = scalar_lea.vmem [#allocation7], %s1596_s21  ;;  %p1602_p11 = scmp.ge.s32.totalorder %s2025_s28, 1 }
  0x2d   : > { %p634_p12 = scmp.lt.s32.totalorder %s2025_s28, 5  ;;  %s2510_s4 = sld [smem:[#allocation21_spill]] }
  0x2e   : > { %s551_s29 = scalar_lea.hbm %s2507_s6, %s1719_s18  ;;  %s594_s6 = sshll.u32 %s586_s17, 4  ;;  %s595_s6 = int_to_ptr.vmem [resolvable:$true] %s594_s6 }
  0x2f   : > { %s552_s2 = sshll.u32 %s551_s29, 4  ;;  %p2207_p13 = pnand %p1602_p11, %p634_p12  ;;  %s553_s2 = int_to_ptr.hbm [resolvable:$true] %s552_s2 }
  0x30   : > { %1758 = dma.hbm_to_vmem [thread:$0]  (!%p2188_p10), %s553_s2, 512, %s555_s23, %s2197_s16, %s2027_s15, %s2027_s15, %s2028_s14  }
  0x31   : > { %s591_s0 = scalar_lea.hbm %s2508_s10, %s1719_s18  ;;  %s1593_s2 = sshll.u32 %s2181_s20, 6 }
  0x32   : > { %s592_s19 = sshll.u32 %s591_s0, 4  ;;  %s1718_s23 = sshll.u32 %s2017_s26, 6  ;;  %s593_s19 = int_to_ptr.hbm [resolvable:$true] %s592_s19 }
  0x33   : > { %s522_s13 = scalar_lea.hbm %s2510_s4, %s1718_s23  ;;  %s517_s21 = scalar_lea.vmem [#allocation3], %s1593_s2 }
  0x34   : > { %s525_s18 = sshll.u32 %s517_s21, 4  ;;  %s523_s0 = sshll.u32 %s522_s13, 4  ;;  %s526_s18 = int_to_ptr.vmem [resolvable:$true] %s525_s18  ;;  %s524_s0 = int_to_ptr.hbm [resolvable:$true] %s523_s0 }
  0x35   : > { %s514_s17 = scalar_lea.sflag [#allocation4], %s2181_s20  ;;  %s2029_s10 = smov 128  }
  0x36   : > { %s2030_s11 = smov 8   ;;  %638 = sbr.rel (%p2207_p13) target bundleno = 2223 (0x8af), region = 84 }
  0x37   : > { %1755 = dma.hbm_to_vmem [thread:$0]  (!%p2188_p10), %s524_s0, 1024, %s526_s18, %s514_s17, %s2029_s10, %s2029_s10, %s2030_s11  }
  0x38   : > { %1761 = dma.hbm_to_vmem [thread:$0]  (!%p2188_p10), %s593_s19, 512, %s595_s6, %s2197_s16, %s2027_s15, %s2027_s15, %s2028_s14  }
  0x39   : > { %s2225_s26 = sand.u32 (!%p2207_p13), 1, %s2001_s22  }
  0x3a   : > { %s1603_s2 = sshll.u32 (!%p2207_p13), %s2225_s26, 6  ;;  %s641_s23 = scalar_lea.sflag (!%p2207_p13), [#allocation4], %s2225_s26 }
  0x3b   : > { %s2229_s30 = scalar_lea.vmem [#allocation3], %s1603_s2 }
  0x3c   : > { %1988 = dma.done.wait (%p2183_p9), %s641_s23, 1024  }
  0x3d   : > { %1990 = vsyncadd (%p2183_p9), %s641_s23, 4294966272  ;;  %s2511_s6 = sadd.s32 4294967295, %s2025_s28   ;;  %s1604_s11 = sshll.u32 %s2225_s26, 5 }
  0x3e   : > { %s650_s10 = sand.u32 1, %s2511_s6   ;;  %s2238_s15 = scalar_lea.vmem [#allocation5], %s1604_s11 }
  0x3f   : > { %s651_s14 = scalar_lea.sflag [#allocation6], %s650_s10 }
  0x40   : > { %1992 = dma.done.wait (%p2183_p9), %s651_s14, 1024  }
  0x41   : > { %1994 = vsyncadd (%p2183_p9), %s651_s14, 4294966272  ;;  %p760_p0 = scmp.lt.s32.totalorder %s2013_s25, 1  ;;  %p767_p1 = scmp.lt.s32.totalorder %s2009_s24, 1 }
  0x42   : > { %s2512_s12 = sld [smem:[#allocation18_spill]]  ;;  %s2305_s18 = scalar_lea.vmem [#allocation7], %s1604_s11 }
  0x43   : > { %s2552_s25 = smov (!%p760_p0, %s2013_s25), 1  ;;  %s2513_s5 = sld [smem:[#allocation22_spill]] }
  0x44   : > { %s2250_s16 = scalar_select %p767_p1, %s2009_s24, 1 }
  0x45   : > { %s1606_s3 = sshll.u32 %s2552_s25, 3  ;;  %s2518_s0 = sld [smem:[#allocation29_spill]] }
  0x46   : > { %s1607_s21 = sshll.u32 %s2250_s16, 1  ;;  %s1721_s28 = sshll.u32 %s2250_s16, 6 }
  0x47   : > { %s2519_s6 = sld [smem:[#allocation30_spill]]  ;;  %p1611_p2 = scmp.ne.s32.totalorder %s2009_s24, 0 }
  0x48   : > { %s763_s13 = scalar_lea.vmem %s2512_s12, %s1606_s3  ;;  %s2520_s4 = sld [smem:[#allocation31_spill]] }
  0x49   : > { %s2264_s17 = scalar_lea.vmem %s2513_s5, %s1607_s21  ;;  %s2521_s20 = sld [smem:[#allocation32_spill]] }
  0x4a   : > { %s2522_s12 = sld [smem:[#allocation33_spill]] }
  0x4b   : > { %s2286_s5 = scalar_lea.vmem %s2518_s0, %s1721_s28  ;;  %s2523_s28 = sld [smem:[#allocation19_spill]] (!%p1611_p2) }
  0x4c   : > { %805 = sbr.rel (%p1611_p2) target bundleno = 351 (0x15f), region = 100 }
  0x4d   : > { %s790_s7 = scalar_lea.vmem %s2519_s6, %s2250_s16 }
  0x4e   : > { %s793_s8 = scalar_lea.vmem %s2520_s4, %s2250_s16 }
  0x4f   : > { %s796_s9 = scalar_lea.vmem %s2521_s20, %s2250_s16  ;;  %s2524_s20 = sld [smem:[#allocation20_spill]] (!%p1611_p2) }
  0x50   : > { %s2303_s22 = scalar_lea.vmem %s2522_s12, %s1606_s3 }
  0x51   : > { %v806_v0 = vld [vmem:[%s763_s13] sm:$0xff]  ;;  %vm809_vm0 = vcmask 523264   ;;  %v2031_v2 = vmov 64.0  }
  0x52   : > { %v810_v1 = vsel %vm809_vm0, %v806_v0, 0.0  ;;  %1838 = vrcp.f32 %v2031_v2  ;;  %v1836_v23 = vld [vmem:[%s2523_s28] ss:$0 sm:$0xff] }
  0x53   : > { %811 = vadd.xlane.f32.xlu0 %v810_v1 }
  0x55   : > { %v1837_v25 = vld [vmem:[%s2524_s20] ss:$0 sm:$0xff] }
  0x58   : > { %v1839_v3 = vpop.eup %1838 }
  0x59   : > { %v814_v4 = vmul.f32 64.0, %v1839_v3  ;;  %vm818_vm1 = vweird.f32 %v1839_v3 }
  0x5b   : > { %v815_v5 = vsub.f32 1.0, %v814_v4 }
  0x5d   : > { %v816_v6 = vmul.f32 %v1839_v3, %v815_v5 }
  0x5f   : > { %v817_v7 = vadd.f32 %v1839_v3, %v816_v6 }
  0x61   : > { %v819_v8 = vsel %vm818_vm1, %v1839_v3, %v817_v7 }
  0xc6   : > { %v812_v9 = vpop.xlane.xlu0 %811 }
  0xc7   : > { %v820_v10 = vmul.f32 %v819_v8, %v812_v9 }
  0xc9   : > { %v821_v11 = vsub.f32 %v806_v0, %v820_v10 }
  0xcb   : > { %v822_v12 = vmul.f32 %v821_v11, %v821_v11 }
  0xcd   : > { %v823_v13 = vsel %vm809_vm0, %v822_v12, 0.0 }
  0xce   : > { %824 = vadd.xlane.f32.xlu0 %v823_v13 }
 0x141   : > { %v825_v14 = vpop.xlane.xlu0 %824 }
 0x142   : > { %v826_v15 = vmul.f32 %v825_v14, %v819_v8 }
 0x144   : > { %v827_v16 = vadd.f32 1e-12, %v826_v15 }
 0x146   : > { %1840 = vrsqrt.f32 %v827_v16  ;;  %vm834_vm3 = vweird.f32 %v827_v16 }
 0x14c   : > { %v1841_v17 = vpop.eup %1840 }
 0x14d   : > { %v829_v18 = vmul.f32 %v1841_v17, %v827_v16  ;;  %vm835_vm2 = vweird.f32 %v1841_v17 }
 0x14e   : > { %vm836_vm4 = vmor %vm834_vm3, %vm835_vm2 }
 0x14f   : > { %v830_v19 = vmul.f32 %v1841_v17, %v829_v18 }
 0x151   : > { %v831_v20 = vmul.f32 0.5, %v830_v19 }
 0x153   : > { %v832_v21 = vsub.f32 1.5, %v831_v20 }
 0x155   : > { %v833_v22 = vmul.f32 %v1841_v17, %v832_v21 }
 0x157   : > { %v837_v24 = vsel %vm836_vm4, %v1841_v17, %v833_v22 }
 0x158   : > { %v838_v26 = vmul.f32 %v837_v24, %v821_v11 }
 0x15a   : > { %v842_v27 = vmul.f32 %v1836_v23, %v838_v26 }
 0x15c   : > { %v846_v28 = vadd.f32 %v1837_v25, %v842_v27 }
 0x15e   : > { %847 = vst.msk [vmem:[#allocation2] sm:$0xff] %vm809_vm0, %v846_v28 }
 0x15f PF: > { %v1638_v29 = vld [vmem:[%s2229_s30 + $0x30] sm:$0xf]  ;;  %v1729_v30 = vld [vmem:[%s2229_s30 + $0x34] sm:$0xf0]  ;;  %v1630_v31 = vld [vmem:[%s2229_s30 + $0x20] sm:$0xf]  ;;  %s2525_s2 = scalar_lea.vmem %s2458_s1, %s2552_s25 }
 0x160   : > { %v1639_v32 = vor.u32 %v1729_v30, %v1638_v29  ;;  %v1727_v33 = vld [vmem:[%s2229_s30 + $0x24] sm:$0xf0]  ;;  %v1622_v35 = vld [vmem:[%s2229_s30 + $0x10] sm:$0xf]  ;;  %v1725_v36 = vld [vmem:[%s2229_s30 + $0x14] sm:$0xf0] }
 0x161   : > { %v1631_v34 = vor.u32 %v1727_v33, %v1630_v31  ;;  %v1623_v37 = vor.u32 %v1725_v36, %v1622_v35  ;;  %v1614_v38 = vld [vmem:[%s2229_s30] sm:$0xf]  ;;  %v1723_v39 = vld [vmem:[%s2229_s30 + $0x4] sm:$0xf0]  ;;  %vm904_vm5 = vcmask 523264   ;;  %s2032_s13 = smov 96  }
 0x162   : > { %912 = vmatpush.bf16.msra.mxu0 %v1639_v32  ;;  %v1615_v40 = vor.u32 %v1723_v39, %v1614_v38  ;;  %v2331_v43 = vld [vmem:[%s2264_s17] sm:$0x3]  ;;  %s2033_s6 = smov 64   ;;  %s2034_s21 = smov 32   ;;  %vm942_vm6 = vcmask 261120   ;;  %vm967_vm7 = vcmask 64512  }
 0x163   : > { %v860_v44 = vperm.slane %v2331_v43, 0  ;;  %v1728_v54 = vld [vmem:[%s2229_s30 + $0x34] sm:$0xf]  ;;  %v1640_v55 = vld [vmem:[%s2229_s30 + $0x38] sm:$0xf0]  ;;  %v861_v19 = vperm.slane %v2331_v43, 1 }
 0x164   : > { %v1726_v56 = vld [vmem:[%s2229_s30 + $0x24] sm:$0xf]  ;;  %v1643_v57 = vor.u32 %v1728_v54, %v1640_v55  ;;  %v1632_v58 = vld [vmem:[%s2229_s30 + $0x28] sm:$0xf0]  ;;  %v934_v60 = vld [vmem:[%s2525_s2] sm:$0x1] }
 0x165   : > { %v2325_v41 = vld [vmem:[#allocation2] sm:$0xff]  ;;  %v1635_v59 = vor.u32 %v1726_v56, %v1632_v58  ;;  %v1724_v61 = vld [vmem:[%s2229_s30 + $0x14] sm:$0xf]  ;;  %v935_v63 = vsub.f32 1.0, %v934_v60  ;;  %v1722_v1 = vld [vmem:[%s2229_s30 + $0x4] sm:$0xf] }
 0x166   : > { %913 = vmatpush.bf16.msra.mxu0 %v1631_v34  ;;  %v849_v42 = vpack.c.bf16 %v2325_v41, %v2325_v41  ;;  %925 = vmatpush.bf16.msra.mxu1 %v1643_v57  ;;  %v1624_v62 = vld [vmem:[%s2229_s30 + $0x18] sm:$0xf0]  ;;  %v1616_v2 = vld [vmem:[%s2229_s30 + $0x8] sm:$0xf0]  ;;  %vm996_vm8 = vcmask 1043456   ;;  %s2526_s23 = sld [smem:[#allocation24_spill]] }
 0x167   : > { %v1627_v0 = vor.u32 %v1724_v61, %v1624_v62  ;;  %v936_v3 = vmul.f32 -1e+09, %v935_v63  ;;  %v1619_v4 = vor.u32 %v1722_v1, %v1616_v2  ;;  %v1733_v61 = vld [vmem:[%s2238_s15 + $0x18] sm:$0xff]  ;;  %v1732_v62 = vld [vmem:[%s2238_s15 + $0x10] sm:$0xff]  ;;  %v1731_v63 = vld [vmem:[%s2238_s15 + $0x8] sm:$0xff]  ;;  %s2528_s26 = sld [smem:[#allocation25_spill]] }
 0x168   : > { %v1730_v1 = vld [vmem:[%s2238_s15] sm:$0xff]  ;;  %s2530_s12 = sld [smem:[#allocation26_spill]] }
 0x169   : > { %v964_v5 = vperm.slane %v936_v3, 0  ;;  %s2532_s28 = sld [smem:[#allocation28_spill]] }
 0x16a   : > { %914 = vmatpush.bf16.msra.mxu0 %v1623_v37  ;;  %926 = vmatpush.bf16.msra.mxu1 %v1635_v59 }
 0x16c   : > { %s2527_s10 = scalar_lea.vmem %s2526_s23, %s2250_s16 }
 0x16d   : > { %s2529_s27 = scalar_lea.vmem %s2528_s26, %s2250_s16 }
 0x16e   : > { %915 = vmatpush.bf16.msra.mxu0 %v1615_v40  ;;  %927 = vmatpush.bf16.msra.mxu1 %v1627_v0 }
 0x16f   : > { %s2533_s11 = scalar_lea.vmem %s2532_s28, %s2250_s16 }
 0x171   : > { %1644 = vmatmul.msk.bf16.vlgmr.msra.gmra.mxu0 %vm904_vm5, %v849_v42 }
 0x172   : > { %928 = vmatpush.bf16.msra.mxu1 %v1619_v4  ;;  %1134 = vmatpush.bf16.msrb.mxu0 %v1733_v61 }
 0x175   : > { %1645 = vmatmul.msk.bf16.vlgmr.msra.gmra.mxu1 %vm904_vm5, %v849_v42 }
 0x176   : > { %1135 = vmatpush.bf16.msrb.mxu0 %v1732_v62 }
 0x17a   : > { %1136 = vmatpush.bf16.msrb.mxu0 %v1731_v63 }
 0x17e   : > { %1137 = vmatpush.bf16.msrb.mxu0 %v1730_v1 }
 0x1ee   : > { %v917_v45 = vpop.f32.mrf.mxu0 }
 0x1ef   : > { %v918_v46 = vadd.f32 %v917_v45, %v860_v44 }
 0x1f1   : > { %v937_v47 = vpack.c.bf16 %v918_v46, %v918_v46 }
 0x1f2   : > { %v930_v20 = vpop.f32.mrf.mxu1 }
 0x1f3   : > { %1013 = vrot.lane.b32.xlu1 %v937_v47, %s2032_s13  ;;  %940 = vrot.lane.b32.xlu0 %v937_v47, %s2033_s6  ;;  %v931_v21 = vadd.f32 %v930_v20, %v861_v19 }
 0x1f5   : > { %v938_v24 = vpack.c.bf16 %v931_v21, %v931_v21 }
 0x1f6   : > { %v919_v48 = vpop.f32.mrf.mxu0 }
 0x1f7   : > { %v998_v27 = vsel %vm996_vm8, %v938_v24, 0 }
 0x1fa   : > { %v932_v29 = vpop.f32.mrf.mxu1 }
 0x1fb   : > { %1015 = vrot.lane.b32.xlu0 %v937_v47, %s2034_s21  ;;  %v1745_v29 = vld [vmem:[%s2286_s5 + $0x38] sm:$0xff] }
 0x265   : > { %v941_v49 = vpop.permute.xlu0 %940  ;;  %v1014_v53 = vpop.permute.xlu1 %1013 }
 0x266   : > { %v947_v50 = vsel %vm942_vm6, %v941_v49, 0 }
 0x267   : > { %956 = vmatpush.bf16.xpose.msra.mxu2 %v947_v50 }
 0x26d   : > { %v1016_v51 = vpop.permute.xlu0 %1015 }
 0x26e   : > { %1646 = vmatmul.msk.bf16.vlgmr.msra.gmra.mxu2 %vm942_vm6, %v937_v47  ;;  %v1021_v52 = vsel %vm942_vm6, %v1016_v51, 0 }
 0x26f   : > { %1030 = vmatpush.bf16.xpose.msra.mxu3 %v1021_v52  ;;  %1007 = vmatpush.bf16.msrb.mxu2 %v998_v27  ;;  %v1735_v27 = vld [vmem:[%s2305_s18 + $0x8] sm:$0xff] }
 0x276   : > { %1648 = vmatmul.msk.bf16.vlgmr.msra.gmra.mxu3 %vm942_vm6, %v1014_v53 }
 0x277   : > { %1314 = vmatpush.bf16.msrb.mxu3 %v1745_v29 }
 0x2f1   : > { %v958_v6 = vpop.f32.mrf.mxu2 }
 0x2f2   : > { %v962_v7 = vmul.f32 0.17677669, %v958_v6 }
 0x2f4   : > { %v966_v8 = vadd.f32 %v964_v5, %v962_v7 }
 0x2f6   : > { %v968_v9 = vsel %vm967_vm7, %v966_v8, -inf }
 0x2f7   : > { %969 = vmax.xlane.f32.xlu1 %v968_v9 }
 0x2f9   : > { %v960_v10 = vpop.f32.mrf.mxu2  ;;  %v1032_v11 = vpop.f32.mrf.mxu3 }
 0x2fa   : > { %v1036_v12 = vmul.f32 0.17677669, %v1032_v11 }
 0x2fc   : > { %v1037_v13 = vadd.f32 %v1036_v12, %v964_v5 }
 0x2fe   : > { %v1038_v14 = vsel %vm967_vm7, %v1037_v13, -inf }
 0x2ff   : > { %1039 = vmax.xlane.f32.xlu2 %v1038_v14  ;;  %v2035_v14 = vmov 64.0  }
 0x301   : > { %v1034_v15 = vpop.f32.mrf.mxu3 }
 0x36a   : > { %v970_v16 = vpop.xlane.xlu1 %969 }
 0x36b   : > { %v971_v17 = vsub.f32 %v966_v8, %v970_v16  ;;  %v1842_v8 = vld [vmem:[%s2527_s10] ss:$0 sm:$0xff] }
 0x36d   : > { %v972_v18 = vmul.f32 1.442695, %v971_v17 }
 0x36f   : > { %1849 = vpow2.f32 %v972_v18 }
 0x372   : > { %v1040_v22 = vpop.xlane.xlu2 %1039 }
 0x373   : > { %v1041_v23 = vsub.f32 %v1037_v13, %v1040_v22 }
 0x375   : > { %v1850_v25 = vpop.eup %1849  ;;  %v1042_v26 = vmul.f32 1.442695, %v1041_v23 }
 0x376   : > { %v974_v28 = vsel %vm967_vm7, %v1850_v25, 0.0 }
 0x377   : > { %1851 = vpow2.f32 %v1042_v26  ;;  %975 = vadd.xlane.f32.xlu2 %v974_v28  ;;  %v1736_v26 = vld [vmem:[%s2305_s18 + $0x10] sm:$0xff]  ;;  %v1734_v28 = vld [vmem:[%s2305_s18] sm:$0xff] }
 0x37d   : > { %v1852_v30 = vpop.eup %1851 }
 0x37e   : > { %v1044_v31 = vsel %vm967_vm7, %v1852_v30, 0.0 }
 0x37f   : > { %1045 = vadd.xlane.f32.xlu0 %v1044_v31 }
 0x38f   : > { %1064 = vrot.lane.b32.xlu2 %v938_v24, %s2032_s13 }
 0x3ea   : > { %v976_v32 = vpop.xlane.xlu2 %975 }
 0x3eb   : > { %1853 = vrcp.f32 %v976_v32  ;;  %v988_v39 = vand.u32 2147483648, %v976_v32  ;;  %v986_v42 = vand.u32 2147483647, %v976_v32  ;;  %vm982_vm10 = vweird.f32 %v976_v32 }
 0x3ed   : > { %v989_v45 = vor.u32 1.1754944e-38, %v988_v39  ;;  %vm987_vm12 = vcmp.eq.f32.partialorder %v986_v42, 8.507059e+37 }
 0x3f1   : > { %v1854_v33 = vpop.eup %1853 }
 0x3f2   : > { %v978_v34 = vmul.f32 %v1854_v33, %v976_v32  ;;  %v1046_v35 = vpop.xlane.xlu0 %1045  ;;  %v1065_v36 = vpop.permute.xlu2 %1064  ;;  %vm983_vm9 = vweird.f32 %v1854_v33  ;;  %v1744_v32 = vld [vmem:[%s2286_s5 + $0x30] sm:$0xff] }
 0x3f3   : > { %1855 = vrcp.f32 %v1046_v35  ;;  %v1070_v38 = vsel %vm996_vm8, %v1065_v36, 0  ;;  %vm984_vm11 = vmor %vm982_vm10, %vm983_vm9  ;;  %v1058_v54 = vand.u32 2147483648, %v1046_v35  ;;  %vm1052_vm14 = vweird.f32 %v1046_v35  ;;  %1315 = vmatpush.bf16.msrb.mxu3 %v1744_v32 }
 0x3f4   : > { %v979_v37 = vsub.f32 1.0, %v978_v34  ;;  %1079 = vmatpush.bf16.msra.mxu2 %v1070_v38  ;;  %v1056_v55 = vand.u32 2147483647, %v1046_v35  ;;  %1857 = vrcp.f32 %v2035_v14 }
 0x3f5   : > { %v1059_v57 = vor.u32 1.1754944e-38, %v1058_v54  ;;  %v1845_v54 = vld [vmem:[%s2533_s11] ss:$0 sm:$0xff] }
 0x3f6   : > { %v980_v40 = vmul.f32 %v1854_v33, %v979_v37  ;;  %vm1057_vm0 = vcmp.eq.f32.partialorder %v1056_v55, 8.507059e+37 }
 0x3f8   : > { %v981_v43 = vadd.f32 %v1854_v33, %v980_v40  ;;  %v1843_v40 = vld [vmem:[%s2529_s27] ss:$0 sm:$0xff] }
 0x3f9   : > { %v1856_v44 = vpop.eup %1855 }
 0x3fa   : > { %v1048_v46 = vmul.f32 %v1856_v44, %v1046_v35  ;;  %v985_v47 = vsel %vm984_vm11, %v1854_v33, %v981_v43  ;;  %vm1053_vm13 = vweird.f32 %v1856_v44  ;;  %v1858_v15 = vpop.eup %1857 }
 0x3fb   : > { %v990_v48 = vsel %vm987_vm12, %v989_v45, %v985_v47  ;;  %vm1054_vm15 = vmor %vm1052_vm14, %vm1053_vm13  ;;  %v1150_v16 = vmul.f32 64.0, %v1858_v15  ;;  %vm1154_vm1 = vweird.f32 %v1858_v15 }
 0x3fc   : > { %v1049_v49 = vsub.f32 1.0, %v1048_v46  ;;  %v991_v50 = vmul.f32 %v1850_v25, %v990_v48  ;;  %v1737_v25 = vld [vmem:[%s2305_s18 + $0x18] sm:$0xff]  ;;  %s2531_s18 = scalar_lea.vmem %s2530_s12, %s2250_s16  ;;  %v1743_v48 = vld [vmem:[%s2286_s5 + $0x28] sm:$0xff] }
 0x3fd   : > { %v1151_v17 = vsub.f32 1.0, %v1150_v16  ;;  %1227 = vmatpush.bf16.msrb.mxu1 %v1737_v25  ;;  %1316 = vmatpush.bf16.msrb.mxu3 %v1743_v48 }
 0x3fe   : > { %v1050_v51 = vmul.f32 %v1856_v44, %v1049_v49  ;;  %v992_v52 = vpack.c.bf16 %v991_v50, %v991_v50  ;;  %v1742_v49 = vld [vmem:[%s2286_s5 + $0x20] sm:$0xff]  ;;  %v1741_v50 = vld [vmem:[%s2286_s5 + $0x18] sm:$0xff] }
 0x3ff   : > { %v1152_v18 = vmul.f32 %v1858_v15, %v1151_v17 }
 0x400   : > { %v1051_v53 = vadd.f32 %v1856_v44, %v1050_v51  ;;  %1647 = vmatmul.msk.bf16.vlgmr.msrb.gmra.mxu2 %vm967_vm7, %v992_v52  ;;  %v1740_v51 = vld [vmem:[%s2286_s5 + $0x10] sm:$0xff]  ;;  %v1739_v52 = vld [vmem:[%s2286_s5 + $0x8] sm:$0xff] }
 0x401   : > { %v1153_v19 = vadd.f32 %v1858_v15, %v1152_v18  ;;  %1228 = vmatpush.bf16.msrb.mxu1 %v1736_v26  ;;  %1317 = vmatpush.bf16.msrb.mxu3 %v1742_v49 }
 0x402   : > { %v1055_v56 = vsel %vm1054_vm15, %v1856_v44, %v1051_v53  ;;  %v1844_v44 = vld [vmem:[%s2531_s18] ss:$0 sm:$0xff] }
 0x403   : > { %v1060_v58 = vsel %vm1057_vm0, %v1059_v57, %v1055_v56  ;;  %v2378_v20 = vsel %vm1154_vm1, %v1858_v15, %v1153_v19  ;;  %v1738_v53 = vld [vmem:[%s2286_s5] sm:$0xff] }
 0x404   : > { %v1061_v59 = vmul.f32 %v1852_v30, %v1060_v58 }
 0x405   : > { %1229 = vmatpush.bf16.msrb.mxu1 %v1735_v27  ;;  %1318 = vmatpush.bf16.msrb.mxu3 %v1741_v50 }
 0x406   : > { %v1062_v60 = vpack.c.bf16 %v1061_v59, %v1061_v59 }
 0x409   : > { %1230 = vmatpush.bf16.msrb.mxu1 %v1734_v28  ;;  %1319 = vmatpush.bf16.msrb.mxu3 %v1740_v51 }
 0x40d   : > { %1320 = vmatpush.bf16.msrb.mxu3 %v1739_v52 }
 0x410   : > { %1649 = vmatmul.msk.bf16.vlgmr.msra.gmra.mxu2 %vm967_vm7, %v1062_v60 }
 0x411   : > { %1321 = vmatpush.bf16.msrb.mxu3 %v1738_v53 }
 0x483   : > { %v1009_v0 = vpop.f32.mrf.mxu2 }
 0x48b   : > { %v1011_v2 = vpop.f32.mrf.mxu2 }
 0x493   : > { %v1081_v3 = vpop.f32.mrf.mxu2 }
 0x494   : > { %1086 = vrot.lane.b32.xlu2 %v1081_v3, %s2034_s21 }
 0x49b   : > { %v1083_v4 = vpop.f32.mrf.mxu2 }
 0x49c   : > { %v1846_v4 = vld [vmem:[%s790_s7] ss:$0 sm:$0xff] }
 0x4ee   : > { %v1087_v5 = vpop.permute.xlu2 %1086 }
 0x4ef   : > { %v1089_v6 = vsel %vm942_vm6, %v1009_v0, %v1087_v5 }
 0x4f0   : > { %v1090_v7 = vpack.c.bf16 %v1089_v6, %v1089_v6 }
 0x4f2   : > { %1666 = vmatmul.msk.bf16.vlgmr.msrb.gmra.mxu0 %vm904_vm5, %v1090_v7 }
 0x56f   : > { %v1139_v9 = vpop.f32.mrf.mxu0 }
 0x570   : > { %v1140_v10 = vadd.f32 %v1842_v8, %v1139_v9 }
 0x572   : > { %v1143_v11 = vadd.f32 %v1140_v10, %v2325_v41 }
 0x574   : > { %v1146_v12 = vsel %vm904_vm5, %v1143_v11, 0.0 }
 0x575   : > { %1147 = vadd.xlane.f32.xlu2 %v1146_v12 }
 0x577   : > { %v1141_v13 = vpop.f32.mrf.mxu0 }
 0x5e8   : > { %v1148_v41 = vpop.xlane.xlu2 %1147 }
 0x5e9   : > { %v1156_v21 = vmul.f32 %v2378_v20, %v1148_v41 }
 0x5eb   : > { %v1157_v22 = vsub.f32 %v1143_v11, %v1156_v21 }
 0x5ed   : > { %v1158_v23 = vmul.f32 %v1157_v22, %v1157_v22 }
 0x5ef   : > { %v1159_v24 = vsel %vm904_vm5, %v1158_v23, 0.0 }
 0x5f0   : > { %1160 = vadd.xlane.f32.xlu1 %v1159_v24  ;;  %v1847_v24 = vld [vmem:[%s793_s8] ss:$0 sm:$0xff] }
 0x663   : > { %v1161_v30 = vpop.xlane.xlu1 %1160 }
 0x664   : > { %v1162_v31 = vmul.f32 %v1161_v30, %v2378_v20 }
 0x666   : > { %v1163_v33 = vadd.f32 1e-12, %v1162_v31 }
 0x668   : > { %1859 = vrsqrt.f32 %v1163_v33  ;;  %vm1170_vm3 = vweird.f32 %v1163_v33 }
 0x66e   : > { %v1860_v34 = vpop.eup %1859 }
 0x66f   : > { %v1165_v35 = vmul.f32 %v1860_v34, %v1163_v33  ;;  %vm1171_vm2 = vweird.f32 %v1860_v34 }
 0x670   : > { %vm1172_vm4 = vmor %vm1170_vm3, %vm1171_vm2 }
 0x671   : > { %v1166_v36 = vmul.f32 %v1860_v34, %v1165_v35 }
 0x673   : > { %v1167_v37 = vmul.f32 0.5, %v1166_v36 }
 0x675   : > { %v1168_v38 = vsub.f32 1.5, %v1167_v37 }
 0x677   : > { %v1169_v39 = vmul.f32 %v1860_v34, %v1168_v38 }
 0x679   : > { %v1173_v42 = vsel %vm1172_vm4, %v1860_v34, %v1169_v39 }
 0x67a   : > { %v1174_v43 = vmul.f32 %v1173_v42, %v1157_v22 }
 0x67c   : > { %v1178_v45 = vmul.f32 %v1843_v40, %v1174_v43 }
 0x67e   : > { %v1182_v46 = vadd.f32 %v1844_v44, %v1178_v45 }
 0x680   : > { %v1183_v47 = vpack.c.bf16 %v1182_v46, %v1182_v46 }
 0x682   : > { %1683 = vmatmul.msk.bf16.vlgmr.msrb.gmra.mxu1 %vm904_vm5, %v1183_v47 }
 0x6ff   : > { %v1232_v55 = vpop.f32.mrf.mxu1 }
 0x700   : > { %v1233_v56 = vadd.f32 %v1845_v54, %v1232_v55 }
 0x702   : > { %v1237_v57 = vmul.f32 0.044715, %v1233_v56  ;;  %v1236_v0 = vmul.f32 0.5, %v1233_v56 }
 0x704   : > { %v1238_v58 = vmul.f32 %v1237_v57, %v1233_v56 }
 0x706   : > { %v1239_v59 = vmul.f32 %v1238_v58, %v1233_v56 }
 0x707   : > { %v1234_v60 = vpop.f32.mrf.mxu1 }
 0x708   : > { %v1240_v61 = vadd.f32 %v1239_v59, %v1233_v56 }
 0x70a   : > { %v1241_v62 = vmul.f32 0.7978846, %v1240_v61 }
 0x70c   : > { %1861 = vtanh.f32 %v1241_v62 }
 0x712   : > { %v1862_v63 = vpop.eup %1861 }
 0x713   : > { %v1243_v1 = vadd.f32 1.0, %v1862_v63 }
 0x715   : > { %v1244_v2 = vmul.f32 %v1243_v1, %v1236_v0 }
 0x717   : > { %v1245_v3 = vpack.c.bf16 %v1244_v2, %v1244_v2 }
 0x719   : > { %1322 = vmatmul.bf16.vlgmr.msrb.gmra.mxu3 %v1245_v3 }
 0x79c   : > { %v1323_v5 = vpop.f32.mrf.mxu3 }
 0x79d   : > { %v1324_v6 = vadd.f32 %v1846_v4, %v1323_v5 }
 0x79f   : > { %v1327_v7 = vadd.f32 %v1324_v6, %v1182_v46 }
 0x7a1   : > { %v1330_v8 = vsel %vm904_vm5, %v1327_v7, 0.0 }
 0x7a2   : > { %1331 = vadd.xlane.f32.xlu0 %v1330_v8 }
 0x7a4   : > { %v1325_v9 = vpop.f32.mrf.mxu3 }
 0x815   : > { %v1332_v10 = vpop.xlane.xlu0 %1331 }
 0x816   : > { %v1333_v11 = vmul.f32 %v1332_v10, %v2378_v20 }
 0x818   : > { %v1334_v12 = vsub.f32 %v1327_v7, %v1333_v11 }
 0x81a   : > { %v1335_v13 = vmul.f32 %v1334_v12, %v1334_v12 }
 0x81c   : > { %v1336_v14 = vsel %vm904_vm5, %v1335_v13, 0.0 }
 0x81d   : > { %1337 = vadd.xlane.f32.xlu1 %v1336_v14 }
 0x890   : > { %v1338_v15 = vpop.xlane.xlu1 %1337 }
 0x891   : > { %v1339_v16 = vmul.f32 %v1338_v15, %v2378_v20  ;;  %v1848_v20 = vld [vmem:[%s796_s9] ss:$0 sm:$0xff] }
 0x893   : > { %v1340_v17 = vadd.f32 1e-12, %v1339_v16 }
 0x895   : > { %1863 = vrsqrt.f32 %v1340_v17  ;;  %vm1347_vm7 = vweird.f32 %v1340_v17 }
 0x89b   : > { %v1864_v18 = vpop.eup %1863 }
 0x89c   : > { %v1342_v19 = vmul.f32 %v1864_v18, %v1340_v17  ;;  %vm1348_vm6 = vweird.f32 %v1864_v18 }
 0x89d   : > { %vm1349_vm8 = vmor %vm1347_vm7, %vm1348_vm6 }
 0x89e   : > { %v1343_v41 = vmul.f32 %v1864_v18, %v1342_v19 }
 0x8a0   : > { %v1344_v21 = vmul.f32 0.5, %v1343_v41 }
 0x8a2   : > { %v1345_v22 = vsub.f32 1.5, %v1344_v21 }
 0x8a4   : > { %v1346_v23 = vmul.f32 %v1864_v18, %v1345_v22 }
 0x8a6   : > { %v1350_v25 = vsel %vm1349_vm8, %v1864_v18, %v1346_v23 }
 0x8a7   : > { %v1351_v26 = vmul.f32 %v1350_v25, %v1334_v12 }
 0x8a9   : > { %v1355_v27 = vmul.f32 %v1847_v24, %v1351_v26 }
 0x8ab   : > { %v1359_v28 = vadd.f32 %v1848_v20, %v1355_v27 }
 0x8ad   : > { %1360 = vst.msk [vmem:[#allocation2] sm:$0xff] %vm904_vm5, %v1359_v28 }
 0x8ae   : > { %1361 = vst.msk [vmem:[%s2303_s22] sm:$0xff] %vm904_vm5, %v1359_v28 }
 0x8af PF: > { %s2537_s2 = sld [smem:[#allocation14_spill]] }
 0x8b0   : > { %s2538_s21 = sld [smem:[#allocation10_spill]] }
 0x8b1   : > { %s2539_s22 = sld [smem:[#allocation11_spill]] }
 0x8b2   : > { %s2540_s23 = sld [smem:[#allocation17_spill]] }
 0x8b3   : > { %s2541_s24 = sld [smem:[#allocation12_spill]] }
 0x8b4   : > { %s2542_s25 = sld [smem:[#allocation13_spill]] }
 0x8b5   : > { %s32_s28 = sadd.s32 1, %s2537_s2   ;;  %s2543_s26 = sld [smem:[#allocation15_spill]] }
 0x8b6   : > { %p29_p3 = scmp.ge.s32.totalorder %s32_s28, 6   ;;  %s2544_s27 = sld [smem:[#allocation16_spill]] }
 0x8b8   :  { %31 = sbr.rel (!%p29_p3) target bundleno = 24 (0x18), region = 185 }
 0x8bd   :  { %1381 = vsyncpa [#allocation4], 1 }
 0x8be   :  { %1383 = vsyncpa [#allocation4 + $0x1], 1 }
 0x8bf   :  { %1384 = vsyncpa [#allocation6], 1 }
 0x8c0   :  { %1386 = vsyncpa [#allocation6 + $0x1], 1 }

</bundles_post_ra>
